<compile_context>
chip_gen: v5e
topology: v5e:2x2
jax: 0.10.0
libtpu: 0.0.40
codegen_flags: <defaults>
</compile_context>

<pallas_src>
import functools

import jax
import jax.numpy as jnp
from jax.experimental import pallas as pl
from jax.experimental.pallas import tpu as pltpu


# ---------------------------------------------------------------------------
# Helpers
# ---------------------------------------------------------------------------

def _choose_tile(dim, preferred, align):
    """Largest divisor of `dim` that is a multiple of `align` and <= `preferred`;
    falls back to the full dim (full-extent blocks are always legal)."""
    if dim <= preferred:
        return dim
    t = (preferred // align) * align
    while t >= align:
        if dim % t == 0:
            return t
        t -= align
    return dim


# ---------------------------------------------------------------------------
# Tiled linear kernel: y = x @ w + b   (bf16 operands, f32 accumulation)
# ---------------------------------------------------------------------------

def _linear_kernel(x_ref, w_ref, b_ref, o_ref, acc_ref):
    @pl.when(pl.program_id(2) == 0)
    def _init():
        acc_ref[...] = jnp.zeros_like(acc_ref)

    acc_ref[...] += jnp.dot(
        x_ref[...].astype(jnp.bfloat16),
        w_ref[...].astype(jnp.bfloat16),
        preferred_element_type=jnp.float32,
    )

    @pl.when(pl.program_id(2) == pl.num_programs(2) - 1)
    def _finalize():
        o_ref[...] = acc_ref[...] + b_ref[...]


def linear(x, w, b):
    """x:(M,K) @ w:(K,N) + b:(1,N) -> (M,N) float32."""
    M, K = x.shape
    N = w.shape[1]
    tm = _choose_tile(M, 256, 8)
    tn = _choose_tile(N, 512, 128)
    tk = _choose_tile(K, 512, 128)
    grid = (M // tm, N // tn, K // tk)
    return pl.pallas_call(
        _linear_kernel,
        grid=grid,
        in_specs=[
            pl.BlockSpec((tm, tk), lambda i, j, k: (i, k)),
            pl.BlockSpec((tk, tn), lambda i, j, k: (k, j)),
            pl.BlockSpec((1, tn), lambda i, j, k: (0, j)),
        ],
        out_specs=pl.BlockSpec((tm, tn), lambda i, j, k: (i, j)),
        out_shape=jax.ShapeDtypeStruct((M, N), jnp.float32),
        scratch_shapes=[pltpu.VMEM((tm, tn), jnp.float32)],
        compiler_params=pltpu.CompilerParams(
            dimension_semantics=("parallel", "parallel", "arbitrary")),
        cost_estimate=pl.CostEstimate(
            flops=2 * M * N * K,
            transcendentals=0,
            bytes_accessed=4 * (M * K + K * N + M * N + N)),
    )(x, w, b)


# ---------------------------------------------------------------------------
# Multi-head attention kernel: all heads per (batch, q-tile) grid step,
# lane-dense (seq, H*dh) layout, optional additive mask.
# ---------------------------------------------------------------------------

def _attn_kernel(*refs, num_heads, head_dim, inv_scale, has_mask):
    if has_mask:
        q_ref, k_ref, v_ref, m_ref, o_ref = refs
        mask = m_ref[...]
    else:
        q_ref, k_ref, v_ref, o_ref = refs
        mask = None

    q = q_ref[0]  # (tq, H*dh) f32
    k = k_ref[0]  # (Sk, H*dh) f32
    v = v_ref[0]  # (Sk, H*dh) f32

    outs = []
    for h in range(num_heads):  # static unroll: heads stay in lanes, one store
        sl = slice(h * head_dim, (h + 1) * head_dim)
        qh = q[:, sl].astype(jnp.bfloat16)
        kh = k[:, sl].astype(jnp.bfloat16)
        vh = v[:, sl].astype(jnp.bfloat16)

        # scores = q @ k^T without materializing a transpose.
        s = jax.lax.dot_general(
            qh, kh, (((1,), (1,)), ((), ())),
            preferred_element_type=jnp.float32)
        s = s * inv_scale
        if has_mask:
            s = s + mask
        # Numerically-stable softmax in f32; reciprocal on the EUP.
        s = s - jnp.max(s, axis=-1, keepdims=True)
        p = jnp.exp(s)
        p = p * pl.reciprocal(jnp.sum(p, axis=-1, keepdims=True), approx=True)

        outs.append(jnp.dot(p.astype(jnp.bfloat16), vh,
                            preferred_element_type=jnp.float32))

    # Lane-dense concat over heads -> single (tq, H*dh) store.
    o_ref[0] = jnp.concatenate(outs, axis=-1)


def attention(q, k, v, mask, *, scale, num_heads):
    """q:(B,Sq,H*dh) k,v:(B,Sk,H*dh) mask:(Sq,Sk) or None -> (B,Sq,H*dh)."""
    B, Sq, HD = q.shape
    Sk = k.shape[1]
    dh = HD // num_heads
    tq = _choose_tile(Sq, 256, 8)
    has_mask = mask is not None

    in_specs = [
        pl.BlockSpec((1, tq, HD), lambda b, i: (b, i, 0)),
        pl.BlockSpec((1, Sk, HD), lambda b, i: (b, 0, 0)),
        pl.BlockSpec((1, Sk, HD), lambda b, i: (b, 0, 0)),
    ]
    args = [q, k, v]
    if has_mask:
        in_specs.append(pl.BlockSpec((tq, Sk), lambda b, i: (i, 0)))
        args.append(mask)

    kernel = functools.partial(
        _attn_kernel, num_heads=num_heads, head_dim=dh,
        inv_scale=1.0 / scale, has_mask=has_mask)

    flops = 4 * B * num_heads * Sq * Sk * dh
    bytes_accessed = 4 * (2 * B * Sq * HD + 2 * B * Sk * HD)
    if has_mask:
        bytes_accessed += 4 * Sq * Sk

    return pl.pallas_call(
        kernel,
        grid=(B, Sq // tq),
        in_specs=in_specs,
        out_specs=pl.BlockSpec((1, tq, HD), lambda b, i: (b, i, 0)),
        out_shape=jax.ShapeDtypeStruct((B, Sq, HD), jnp.float32),
        compiler_params=pltpu.CompilerParams(
            dimension_semantics=("parallel", "parallel")),
        cost_estimate=pl.CostEstimate(
            flops=flops,
            transcendentals=B * num_heads * Sq * Sk,
            bytes_accessed=bytes_accessed),
    )(*args)


# ---------------------------------------------------------------------------
# MultiHeadAttention forward (matches the PyTorch module semantics)
# ---------------------------------------------------------------------------

def mha_forward(params, query, key, value, mask=None, *, num_heads, head_dim):
    B, Sq, D = query.shape
    Sk = key.shape[1]
    HD = num_heads * head_dim
    w_qkv, b_qkv = params["w_qkv"], params["b_qkv"]

    q2d = query.reshape(B * Sq, D)
    if query is key and key is value:
        # Self-attention: single fused (D, 3*H*dh) projection.
        qkv = linear(q2d, w_qkv, b_qkv)
        q, k, v = qkv[:, :HD], qkv[:, HD:2 * HD], qkv[:, 2 * HD:]
    else:
        q = linear(q2d, w_qkv[:, :HD], b_qkv[:, :HD])
        k2d = key.reshape(B * Sk, D)
        if key is value:
            kv = linear(k2d, w_qkv[:, HD:], b_qkv[:, HD:])
            k, v = kv[:, :HD], kv[:, HD:]
        else:
            k = linear(k2d, w_qkv[:, HD:2 * HD], b_qkv[:, HD:2 * HD])
            v = linear(value.reshape(B * Sk, D),
                       w_qkv[:, 2 * HD:], b_qkv[:, 2 * HD:])

    q = q.reshape(B, Sq, HD)
    k = k.reshape(B, Sk, HD)
    v = v.reshape(B, Sk, HD)

    # PyTorch module: scale = sqrt(query.size(-1)) AFTER projection = sqrt(dh).
    attn = attention(q, k, v, mask, scale=float(head_dim) ** 0.5,
                     num_heads=num_heads)                     # (B, Sq, H*dh)

    out = linear(attn.reshape(B * Sq, HD), params["w_out"], params["b_out"])
    return out.reshape(B, Sq, D)


# ---------------------------------------------------------------------------
# Deterministic parameter init (shapes follow the PyTorch module __init__)
# ---------------------------------------------------------------------------

def init_mha_params(key, *, num_heads, dim_in, dim_k, dim_v):
    # The reference module requires dim_k == dim_v for q @ k^T to be valid.
    assert dim_k == dim_v
    dh = dim_k
    HD = num_heads * dh
    k1, k2, k3, k4 = jax.random.split(key, 4)
    bound_in = 1.0 / (dim_in ** 0.5)
    w_qkv = jax.random.uniform(k1, (dim_in, 3 * HD), jnp.float32,
                               -bound_in, bound_in)
    b_qkv = jax.random.uniform(k2, (1, 3 * HD), jnp.float32,
                               -bound_in, bound_in)
    bound_o = 1.0 / (HD ** 0.5)
    w_out = jax.random.uniform(k3, (HD, dim_in), jnp.float32, -bound_o, bound_o)
    b_out = jax.random.uniform(k4, (1, dim_in), jnp.float32, -bound_o, bound_o)
    return dict(w_qkv=w_qkv, b_qkv=b_qkv, w_out=w_out, b_out=b_out)


# ---------------------------------------------------------------------------
# Pure-JAX reference (f32) for a numerical sanity check
# ---------------------------------------------------------------------------

def mha_reference(params, query, key, value, mask, *, num_heads, head_dim):
    HD = num_heads * head_dim
    w_qkv, b_qkv = params["w_qkv"], params["b_qkv"]
    q = query @ w_qkv[:, :HD] + b_qkv[0, :HD]
    k = key @ w_qkv[:, HD:2 * HD] + b_qkv[0, HD:2 * HD]
    v = value @ w_qkv[:, 2 * HD:] + b_qkv[0, 2 * HD:]
    B, Sq, _ = q.shape
    Sk = k.shape[1]
    qh = q.reshape(B, Sq, num_heads, head_dim).transpose(0, 2, 1, 3)
    kh = k.reshape(B, Sk, num_heads, head_dim).transpose(0, 2, 1, 3)
    vh = v.reshape(B, Sk, num_heads, head_dim).transpose(0, 2, 1, 3)
    s = jnp.einsum("bhqd,bhkd->bhqk", qh, kh) / (float(head_dim) ** 0.5)
    if mask is not None:
        s = s + mask
    p = jax.nn.softmax(s, axis=-1)
    o = jnp.einsum("bhqk,bhkd->bhqd", p, vh)
    o = o.transpose(0, 2, 1, 3).reshape(B, Sq, HD)
    return o @ params["w_out"] + params["b_out"][0]


# ---------------------------------------------------------------------------
# Main
# ---------------------------------------------------------------------------

if __name__ == "__main__":
    B, S, D = 2, 8, 32     # batch, seq, dim_in
    H, DH = 4, 8           # num_heads, dim_k == dim_v per head

    root = jax.random.PRNGKey(0)
    k_param, k_x = jax.random.split(root)
    params = init_mha_params(k_param, num_heads=H, dim_in=D, dim_k=DH, dim_v=DH)

    x = jax.random.normal(k_x, (B, S, D), jnp.float32)

    # Causal additive mask, as the module would receive for decoder self-attn.
    causal = jnp.where(
        jnp.triu(jnp.ones((S, S), dtype=bool), k=1), -1e9, 0.0
    ).astype(jnp.float32)

    out_masked = mha_forward(params, x, x, x, causal, num_heads=H, head_dim=DH)
    out_nomask = mha_forward(params, x, x, x, None, num_heads=H, head_dim=DH)
    out_masked, out_nomask = jax.block_until_ready((out_masked, out_nomask))

    assert out_masked.shape == (B, S, D), out_masked.shape
    assert out_nomask.shape == (B, S, D), out_nomask.shape
    assert bool(jnp.all(jnp.isfinite(out_masked)))
    assert bool(jnp.all(jnp.isfinite(out_nomask)))

    ref_masked = mha_reference(params, x, x, x, causal, num_heads=H, head_dim=DH)
    ref_nomask = mha_reference(params, x, x, x, None, num_heads=H, head_dim=DH)
    assert bool(jnp.allclose(out_masked, ref_masked, atol=5e-2, rtol=5e-2))
    assert bool(jnp.allclose(out_nomask, ref_nomask, atol=5e-2, rtol=5e-2))

    print("KERNEL_OK")
</pallas_src>

<mosaic_0001>
module attributes {stable_mosaic.version = 11 : i64} {
  func.func @_linear_kernel(%arg0: i32, %arg1: i32, %arg2: i32, %arg3: memref<16x32xf32, #tpu.memory_space<vmem>>, %arg4: memref<32x96xf32, #tpu.memory_space<vmem>>, %arg5: memref<1x96xf32, #tpu.memory_space<vmem>>, %arg6: memref<16x96xf32, #tpu.memory_space<vmem>>, %arg7: memref<16x96xf32, #tpu.memory_space<vmem>>) attributes {dimension_semantics = [#tpu.dimension_semantics<parallel>, #tpu.dimension_semantics<parallel>, #tpu.dimension_semantics<arbitrary>], iteration_bounds = array<i64: 1, 1, 1>, scalar_prefetch = 0 : i64, scratch_operands = 1 : i64, tpu.core_type = #tpu.core_type<tc>, window_params = [{transform_indices = @transform_0, window_bounds = array<i64: 16, 32>}, {transform_indices = @transform_1, window_bounds = array<i64: 32, 96>}, {transform_indices = @transform_2, window_bounds = array<i64: 1, 96>}, {transform_indices = @transform_3, window_bounds = array<i64: 16, 96>}]} {
    %c0_i32 = arith.constant 0 : i32
    %0 = arith.cmpi eq, %arg2, %c0_i32 : i32
    %1 = arith.extui %0 : i1 to i32
    %c0_i32_0 = arith.constant 0 : i32
    %2 = arith.cmpi ne, %1, %c0_i32_0 : i32
    scf.if %2 {
      %cst_10 = arith.constant 0.000000e+00 : f32
      %14 = vector.broadcast %cst_10 : f32 to vector<16x96xf32>
      %c0_11 = arith.constant 0 : index
      %c0_12 = arith.constant 0 : index
      %15 = vector.load %arg7[%c0_11, %c0_12] : memref<16x96xf32, #tpu.memory_space<vmem>>, vector<16x96xf32>
      tpu.vector_store %arg7[%c0_11, %c0_12], %14 {strides = array<i32>} : memref<16x96xf32, #tpu.memory_space<vmem>>, vector<16x96xf32>,
    } else {
    }
    %c0 = arith.constant 0 : index
    %c0_1 = arith.constant 0 : index
    %3 = vector.load %arg7[%c0, %c0_1] : memref<16x96xf32, #tpu.memory_space<vmem>>, vector<16x96xf32>
    %c0_2 = arith.constant 0 : index
    %c0_3 = arith.constant 0 : index
    %4 = vector.load %arg3[%c0_2, %c0_3] : memref<16x32xf32, #tpu.memory_space<vmem>>, vector<16x32xf32>
    %5 = arith.truncf %4 : vector<16x32xf32> to vector<16x32xbf16>
    %c0_4 = arith.constant 0 : index
    %c0_5 = arith.constant 0 : index
    %6 = vector.load %arg4[%c0_4, %c0_5] : memref<32x96xf32, #tpu.memory_space<vmem>>, vector<32x96xf32>
    %7 = arith.truncf %6 : vector<32x96xf32> to vector<32x96xbf16>
    %cst = arith.constant dense<0.000000e+00> : vector<16x96xf32>
    %8 = tpu.matmul %5, %7, %cst {dimension_numbers = #tpu.dot_dimension_numbers<[1], [0], [0], [1], [0, 0, 1, 1], [], []>} : vector<16x32xbf16>, vector<32x96xbf16>, vector<16x96xf32> -> vector<16x96xf32>
    %9 = arith.addf %3, %8 : vector<16x96xf32>
    %c0_6 = arith.constant 0 : index
    %c0_7 = arith.constant 0 : index
    %10 = vector.load %arg7[%c0_6, %c0_7] : memref<16x96xf32, #tpu.memory_space<vmem>>, vector<16x96xf32>
    tpu.vector_store %arg7[%c0_6, %c0_7], %9 {strides = array<i32>} : memref<16x96xf32, #tpu.memory_space<vmem>>, vector<16x96xf32>,
    %c0_i32_8 = arith.constant 0 : i32
    %11 = arith.cmpi eq, %arg2, %c0_i32_8 : i32
    %12 = arith.extui %11 : i1 to i32
    %c0_i32_9 = arith.constant 0 : i32
    %13 = arith.cmpi ne, %12, %c0_i32_9 : i32
    scf.if %13 {
      %c0_10 = arith.constant 0 : index
      %c0_11 = arith.constant 0 : index
      %14 = vector.load %arg7[%c0_10, %c0_11] : memref<16x96xf32, #tpu.memory_space<vmem>>, vector<16x96xf32>
      %c0_12 = arith.constant 0 : index
      %c0_13 = arith.constant 0 : index
      %15 = vector.load %arg5[%c0_12, %c0_13] : memref<1x96xf32, #tpu.memory_space<vmem>>, vector<1x96xf32>
      %16 = vector.broadcast %15 : vector<1x96xf32> to vector<16x96xf32>
      %17 = arith.addf %14, %16 : vector<16x96xf32>
      %c0_14 = arith.constant 0 : index
      %c0_15 = arith.constant 0 : index
      %18 = vector.load %arg6[%c0_14, %c0_15] : memref<16x96xf32, #tpu.memory_space<vmem>>, vector<16x96xf32>
      tpu.vector_store %arg6[%c0_14, %c0_15], %17 {strides = array<i32>} : memref<16x96xf32, #tpu.memory_space<vmem>>, vector<16x96xf32>,
    } else {
    }
    return
  }
  func.func @transform_0(%arg0: i32, %arg1: i32, %arg2: i32) -> (i32, i32) {
    %c0_i32 = arith.constant 0 : i32
    return %arg0, %arg2 : i32, i32
  }
  func.func @transform_1(%arg0: i32, %arg1: i32, %arg2: i32) -> (i32, i32) {
    %c0_i32 = arith.constant 0 : i32
    return %arg2, %arg1 : i32, i32
  }
  func.func @transform_2(%arg0: i32, %arg1: i32, %arg2: i32) -> (i32, i32) {
    %c0_i32 = arith.constant 0 : i32
    %c0_i32_0 = arith.constant 0 : i32
    return %c0_i32, %arg1 : i32, i32
  }
  func.func @transform_3(%arg0: i32, %arg1: i32, %arg2: i32) -> (i32, i32) {
    %c0_i32 = arith.constant 0 : i32
    return %arg0, %arg1 : i32, i32
  }
}

</mosaic_0001>

<bundles_post_ra>
// kernel: tpu_custom_call.1
= control target key start
LH: loop header
LB: loop body
LE: loop exit
PB: predicated region body
PF: predicated region fallthrough
CT: control target
= control target key end

     0   :  { %8 = vsyncpa [#allocation4], 0  ;;  %s261_s0 = inlined_call_operand.hbm [shape: f32[16,32], index: 0, kind: input, shape index: {}]   ;;  %s262_s1 = inlined_call_operand.hbm [shape: f32[32,96], index: 1, kind: input, shape index: {}]   ;;  %s263_s2 = inlined_call_operand.vmem [shape: f32[1,96], index: 2, kind: input, shape index: {}]   ;;  %s264_s3 = inlined_call_operand.hbm [shape: f32[16,96], index: 3, kind: output, shape index: {}]  }
   0x1   :  { %9 = vsyncpa [#allocation7], 0 }
   0x2   :  { %10 = vsyncpa [#allocation5], 0  ;;  %s15_s14 = sshll.u32 %s261_s0, 4  ;;  %s208_s15 = smov [#allocation3]   ;;  %s16_s14 = int_to_ptr.hbm [resolvable:$true] %s15_s14 }
   0x3   :  { %s17_s16 = sshll.u32 %s208_s15, 4  ;;  %s28_s19 = sshll.u32 %s262_s1, 4  ;;  %s18_s16 = int_to_ptr.vmem [resolvable:$true] %s17_s16  ;;  %s29_s19 = int_to_ptr.hbm [resolvable:$true] %s28_s19 }
   0x4   :  { %s209_s20 = smov 128   ;;  %s210_s21 = smov 8  }
   0x5   :  { %23 = dma.hbm_to_vmem [thread:$0]  %s16_s14, 256, %s18_s16, [#allocation4], %s209_s20, %s209_s20, %s210_s21  }
   0x6   :  { %s211_s22 = smov [#allocation6]  }
   0x7   :  { %s30_s23 = sshll.u32 %s211_s22, 4  ;;  %s31_s23 = int_to_ptr.vmem [resolvable:$true] %s30_s23 }
   0x8   :  { %36 = dma.hbm_to_vmem [thread:$0]  %s29_s19, 512, %s31_s23, [#allocation7], %s209_s20, %s209_s20, %s210_s21  }
   0x9   :  { %202 = dma.done.wait [#allocation4], 256  }
   0xa   :  { %203 = vsyncadd [#allocation4], 4294967040 }
   0xb   :  { %204 = dma.done.wait [#allocation7], 512  }
   0xc   :  { %205 = vsyncadd [#allocation7], 4294966784  ;;  %vm52_vm0 = vcmask 785408   ;;  %v212_v0 = vmov 0.0   ;;  %v62_v1 = vld [vmem:[#allocation6 + $0x10] sm:$0xff]  ;;  %v63_v2 = vld [vmem:[#allocation6 + $0x18] sm:$0xff] }
   0xd   :  { %53 = vst.msk [vmem:[#allocation2] sm:$0xff] %vm52_vm0, %v212_v0  ;;  %v60_v3 = vld [vmem:[#allocation6] sm:$0xff]  ;;  %v65_v4 = vpack.c.bf16 %v63_v2, %v62_v1  ;;  %v61_v5 = vld [vmem:[#allocation6 + $0x8] sm:$0xff]  ;;  %v57_v7 = vld [vmem:[#allocation3] sm:$0xff]  ;;  %vm66_vm1 = vcmask 261120   ;;  %s213_s24 = smov [#allocation8]  }
   0xe   :  { %54 = vst.msk [vmem:[#allocation2 + $0x8] sm:$0xff] %vm52_vm0, %v212_v0  ;;  %v64_v6 = vpack.c.bf16 %v61_v5, %v60_v3  ;;  %v58_v8 = vld [vmem:[#allocation3 + $0x8] sm:$0xff]  ;;  %v129_v14 = vld [vmem:[%s263_s2] ss:$0 sm:$0xff]  ;;  %s106_s25 = sshll.u32 %s213_s24, 4  ;;  %s108_s28 = sshll.u32 %s264_s3, 4  ;;  %s107_s25 = int_to_ptr.vmem [resolvable:$true] %s106_s25  ;;  %s109_s28 = int_to_ptr.hbm [resolvable:$true] %s108_s28 }
   0xf   :  { %76 = vmatpush.bf16.msra.mxu0 %v65_v4  ;;  %v59_v9 = vpack.c.bf16 %v58_v8, %v57_v7 }
  0x13   :  { %77 = vmatpush.bf16.msra.mxu0 %v64_v6 }
  0x14   :  { %v55_v10 = vld [vmem:[#allocation2] sm:$0xff] }
  0x15   :  { %v56_v13 = vld [vmem:[#allocation2 + $0x8] sm:$0xff] }
  0x16   :  { %122 = vmatmul.msk.bf16.vlgmr.msra.gmra.mxu0 %vm66_vm1, %v59_v9 }
  0x93   :  { %v79_v11 = vpop.f32.mrf.mxu0 }
  0x94   :  { %v84_v12 = vadd.f32 %v79_v11, %v55_v10 }
  0x96   :  { %87 = vst.msk [vmem:[#allocation2] sm:$0xff] %vm52_vm0, %v84_v12 }
  0x9b   :  { %v81_v15 = vpop.f32.mrf.mxu0 }
  0x9c   :  { %v85_v16 = vadd.f32 %v81_v15, %v56_v13 }
  0x9d   :  { %v92_v17 = vld [vmem:[#allocation2] sm:$0xff] }
  0x9e   :  { %88 = vst.msk [vmem:[#allocation2 + $0x8] sm:$0xff] %vm52_vm0, %v85_v16  ;;  %v98_v18 = vadd.f32 %v129_v14, %v92_v17 }
  0xa0   :  { %100 = vst.msk [vmem:[#allocation8] sm:$0xff] %vm52_vm0, %v98_v18 }
  0xa5   :  { %v93_v19 = vld [vmem:[#allocation2 + $0x8] sm:$0xff] }
  0xa6   :  { %v99_v20 = vadd.f32 %v129_v14, %v93_v19 }
  0xa8   :  { %101 = vst.msk [vmem:[#allocation8 + $0x8] sm:$0xff] %vm52_vm0, %v99_v20 }
  0xa9   :  { %114 = dma.vmem_to_hbm [thread:$0]  %s107_s25, 256, %s109_s28, [#allocation5], %s209_s20, %s209_s20, %s210_s21  }
  0xaa   :  { %206 = dma.done.wait [#allocation5], 256  }
  0xab   :  { %207 = vsyncadd [#allocation5], 4294967040 }
  0xac   :  { %119 = vsyncpa [#allocation4], 1 }
  0xad   :  { %120 = vsyncpa [#allocation7], 1 }
  0xae   :  { %121 = vsyncpa [#allocation5], 1 }

</bundles_post_ra>
